<compile_context>
chip_gen: v5e
topology: v5e:2x2
jax: 0.10.0
libtpu: 0.0.40
codegen_flags: <defaults>
</compile_context>

<pallas_src>
import math

import jax
import jax.numpy as jnp
from jax.experimental import pallas as pl
from jax.experimental.pallas import tpu as pltpu

MAX_PRICE = 2.0
MIN_PRICE = -0.5


def _round_up(x, m):
    return ((x + m - 1) // m) * m


def _make_kernel(num_hidden, intent_size):
    """Fused kernel: hidden MLP + both heads + price clamp, one lane-dense store."""

    def kernel(*refs):
        x_ref = refs[0]
        hidden_refs = refs[1:1 + 2 * num_hidden]
        wo_ref = refs[1 + 2 * num_hidden]          # (H, OUT_W)  fused + zero-padded heads
        bo_ref = refs[2 + 2 * num_hidden]          # (1, OUT_W)
        out_ref = refs[3 + 2 * num_hidden]         # (TM, OUT_W) lane-dense output slab

        f32 = jnp.float32
        h = x_ref[...]
        # hidden_layers: [Linear, ReLU] * num_hidden (unrolled at trace time)
        for l in range(num_hidden):
            w_ref = hidden_refs[2 * l]
            b_ref = hidden_refs[2 * l + 1]
            h = jnp.dot(h.astype(w_ref.dtype), w_ref[...],
                        preferred_element_type=f32) + b_ref[...]
            h = jnp.maximum(h, 0.0)

        # intent_layer + price_layer(mean col) fused into one matmul: W = [Wi | wp0 | 0...]
        z = jnp.dot(h.astype(wo_ref.dtype), wo_ref[...],
                    preferred_element_type=f32) + bo_ref[...]

        # Price clamp (exactly mirrors the torch masking arithmetic):
        #   >= max_price -> 1.0, then <= min_price -> 0.0.
        # Computed on every lane (cheap VPU elementwise) and merged into the
        # price column with a lane-index mask -> no lane slicing, one full
        # lane-dense store.
        clamped = jnp.where(z < MAX_PRICE, z, 1.0)
        clamped = jnp.where(clamped > MIN_PRICE, clamped, 0.0)
        is_price = jax.lax.broadcasted_iota(jnp.int32, z.shape, 1) == intent_size
        out_ref[...] = jnp.where(is_price, clamped, z).astype(out_ref.dtype)

    return kernel


def _choose_block_rows(B, sublane):
    """Row tile: padding bounded by one sublane group; >=2 tiles for v7x megacore."""
    cap = 2048 if B >= 4096 else 512          # huge VMEM headroom at these dims
    min_tiles = 2 if B > sublane else 1       # use both v7x TensorCores when possible
    n_tiles = max(min_tiles, pl.cdiv(B, cap))
    return _round_up(pl.cdiv(B, n_tiles), sublane)


def policy_decoder(e_output, params, *, intent_size, block_rows=None,
                   matmul_dtype=jnp.bfloat16):
    """Full PolicyDecoder forward; returns (policy, p_mean, p_var)."""
    B, E = e_output.shape
    hidden = params["hidden"]                      # list of (W(in,out), b(1,out))
    num_hidden = len(hidden)
    H = hidden[-1][0].shape[1]

    # Fuse heads into one matmul and zero-pad to a lane-dense output width.
    # Only the price MEAN column is needed (p_var is a constant in forward).
    OUT_W = _round_up(intent_size + 1, 128)
    wo = jnp.concatenate([params["wi"], params["wp"][:, :1]], axis=1)   # (H, intent+1)
    bo = jnp.concatenate([params["bi"], params["bp"][:, :1]], axis=1)   # (1, intent+1)
    wo = jnp.pad(wo, ((0, 0), (0, OUT_W - wo.shape[1])))
    bo = jnp.pad(bo, ((0, 0), (0, OUT_W - bo.shape[1])))

    is_bf16 = jnp.dtype(matmul_dtype) == jnp.dtype(jnp.bfloat16)
    sublane = 16 if is_bf16 else 8
    TM = block_rows if block_rows is not None else _choose_block_rows(B, sublane)
    TM = _round_up(TM, sublane)
    B_pad = _round_up(B, TM)

    x = e_output.astype(matmul_dtype)
    if B_pad != B:
        x = jnp.pad(x, ((0, B_pad - B), (0, 0)))

    weight_args = []
    flops_per_row = 0
    for (w, b) in hidden:
        weight_args += [w.astype(matmul_dtype), b.astype(jnp.float32)]
        flops_per_row += 2 * w.shape[0] * w.shape[1]
    weight_args += [wo.astype(matmul_dtype), bo.astype(jnp.float32)]
    flops_per_row += 2 * H * OUT_W

    def resident(a):
        # Full-array block, constant index_map -> stays VMEM-resident across steps.
        return pl.BlockSpec(a.shape, lambda i: (0, 0))

    in_specs = [pl.BlockSpec((TM, E), lambda i: (i, 0))] + [resident(a) for a in weight_args]
    out_specs = pl.BlockSpec((TM, OUT_W), lambda i: (i, 0))
    out_shape = jax.ShapeDtypeStruct((B_pad, OUT_W), jnp.float32)

    def nbytes(a):
        return a.size * a.dtype.itemsize

    cost = pl.CostEstimate(
        flops=B_pad * flops_per_row,
        transcendentals=0,
        bytes_accessed=nbytes(x) + sum(nbytes(a) for a in weight_args) + B_pad * OUT_W * 4,
    )

    out_pad = pl.pallas_call(
        _make_kernel(num_hidden, intent_size),
        grid=(B_pad // TM,),
        in_specs=in_specs,
        out_specs=out_specs,
        out_shape=out_shape,
        compiler_params=pltpu.CompilerParams(
            dimension_semantics=("parallel",),   # v7x: shard row tiles over 2 TCs
        ),
        cost_estimate=cost,
    )(x, *weight_args)

    policy = out_pad[:B, :intent_size]
    p_mean = out_pad[:B, intent_size]
    # logvar is overwritten to a constant in the torch forward; no kernel work needed.
    p_var = jnp.full((B,), math.log(0.1), jnp.float32)
    return policy, p_mean, p_var


def _reference(e_output, params):
    h = e_output
    for (w, b) in params["hidden"]:
        h = jnp.maximum(h @ w + b, 0.0)
    policy = h @ params["wi"] + params["bi"]
    p_dis = h @ params["wp"] + params["bp"]
    p_raw = p_dis[:, 0]
    p_mean = jnp.where(p_raw < MAX_PRICE, p_raw, 1.0)
    p_mean = jnp.where(p_mean > MIN_PRICE, p_mean, 0.0)
    p_var = jnp.full_like(p_mean, math.log(0.1))
    return policy, p_mean, p_var


if __name__ == "__main__":
    key = jax.random.PRNGKey(0)
    B = 8
    ENCODER_SIZE = 64
    HIDDEN_SIZE = 128     # module default
    INTENT_SIZE = 16
    NUM_LAYER = 2         # module default

    ks = jax.random.split(key, 12)
    scale = 0.3

    e_output = jax.random.normal(ks[0], (B, ENCODER_SIZE), jnp.float32)

    idx = 1
    hidden = []
    last = ENCODER_SIZE
    for _ in range(NUM_LAYER):
        w = scale * jax.random.normal(ks[idx], (last, HIDDEN_SIZE), jnp.float32)
        b = scale * jax.random.normal(ks[idx + 1], (1, HIDDEN_SIZE), jnp.float32)
        hidden.append((w, b))
        last = HIDDEN_SIZE
        idx += 2

    params = {
        "hidden": hidden,
        "wi": scale * jax.random.normal(ks[idx], (last, INTENT_SIZE), jnp.float32),
        "bi": scale * jax.random.normal(ks[idx + 1], (1, INTENT_SIZE), jnp.float32),
        "wp": scale * jax.random.normal(ks[idx + 2], (last, 2), jnp.float32),
        "bp": scale * jax.random.normal(ks[idx + 3], (1, 2), jnp.float32),
    }

    ref_policy, ref_pmean, ref_pvar = _reference(e_output, params)

    # Exact-numerics path (f32 MXU inputs): validated against the pure-JAX reference.
    policy, p_mean, p_var = policy_decoder(
        e_output, params, intent_size=INTENT_SIZE, matmul_dtype=jnp.float32)
    jax.block_until_ready((policy, p_mean, p_var))
    assert policy.shape == (B, INTENT_SIZE)
    assert p_mean.shape == (B,)
    assert p_var.shape == (B,)
    assert jnp.allclose(policy, ref_policy, atol=1e-4, rtol=1e-4)
    assert jnp.allclose(p_mean, ref_pmean, atol=1e-4, rtol=1e-4)
    assert jnp.allclose(p_var, ref_pvar)

    # Default fast path (bf16 MXU inputs, f32 accumulation + f32 epilogue).
    policy_bf, p_mean_bf, p_var_bf = policy_decoder(
        e_output, params, intent_size=INTENT_SIZE)
    jax.block_until_ready((policy_bf, p_mean_bf, p_var_bf))
    assert policy_bf.shape == (B, INTENT_SIZE)
    assert p_mean_bf.shape == (B,)
    assert bool(jnp.all(jnp.isfinite(policy_bf))) and bool(jnp.all(jnp.isfinite(p_mean_bf)))

    print("KERNEL_OK")
</pallas_src>

<mosaic_0001>
module attributes {stable_mosaic.version = 11 : i64} {
  func.func @kernel(%arg0: i32, %arg1: memref<8x64xf32, #tpu.memory_space<vmem>>, %arg2: memref<64x128xf32, #tpu.memory_space<vmem>>, %arg3: memref<1x128xf32, #tpu.memory_space<vmem>>, %arg4: memref<128x128xf32, #tpu.memory_space<vmem>>, %arg5: memref<1x128xf32, #tpu.memory_space<vmem>>, %arg6: memref<128x128xf32, #tpu.memory_space<vmem>>, %arg7: memref<1x128xf32, #tpu.memory_space<vmem>>, %arg8: memref<8x128xf32, #tpu.memory_space<vmem>>) attributes {dimension_semantics = [#tpu.dimension_semantics<parallel>], iteration_bounds = array<i64: 1>, scalar_prefetch = 0 : i64, scratch_operands = 0 : i64, tpu.core_type = #tpu.core_type<tc>, window_params = [{transform_indices = @transform_0, window_bounds = array<i64: 8, 64>}, {pipeline_mode = #tpu.pipeline_mode<synchronous>, transform_indices = @transform_1, window_bounds = array<i64: 64, 128>}, {pipeline_mode = #tpu.pipeline_mode<synchronous>, transform_indices = @transform_2, window_bounds = array<i64: 1, 128>}, {pipeline_mode = #tpu.pipeline_mode<synchronous>, transform_indices = @transform_3, window_bounds = array<i64: 128, 128>}, {pipeline_mode = #tpu.pipeline_mode<synchronous>, transform_indices = @transform_4, window_bounds = array<i64: 1, 128>}, {pipeline_mode = #tpu.pipeline_mode<synchronous>, transform_indices = @transform_5, window_bounds = array<i64: 128, 128>}, {pipeline_mode = #tpu.pipeline_mode<synchronous>, transform_indices = @transform_6, window_bounds = array<i64: 1, 128>}, {transform_indices = @transform_7, window_bounds = array<i64: 8, 128>}]} {
    %c0 = arith.constant 0 : index
    %c0_0 = arith.constant 0 : index
    %0 = vector.load %arg1[%c0, %c0_0] : memref<8x64xf32, #tpu.memory_space<vmem>>, vector<8x64xf32>
    %c0_1 = arith.constant 0 : index
    %c0_2 = arith.constant 0 : index
    %1 = vector.load %arg2[%c0_1, %c0_2] : memref<64x128xf32, #tpu.memory_space<vmem>>, vector<64x128xf32>
    %cst = arith.constant dense<0.000000e+00> : vector<8x128xf32>
    %2 = tpu.matmul %0, %1, %cst {dimension_numbers = #tpu.dot_dimension_numbers<[1], [0], [0], [1], [0, 0, 1, 1], [], []>} : vector<8x64xf32>, vector<64x128xf32>, vector<8x128xf32> -> vector<8x128xf32>
    %c0_3 = arith.constant 0 : index
    %c0_4 = arith.constant 0 : index
    %3 = vector.load %arg3[%c0_3, %c0_4] : memref<1x128xf32, #tpu.memory_space<vmem>>, vector<1x128xf32>
    %4 = vector.broadcast %3 : vector<1x128xf32> to vector<8x128xf32>
    %5 = arith.addf %2, %4 : vector<8x128xf32>
    %cst_5 = arith.constant 0.000000e+00 : f32
    %6 = vector.broadcast %cst_5 : f32 to vector<8x128xf32>
    %7 = arith.maximumf %5, %6 : vector<8x128xf32>
    %c0_6 = arith.constant 0 : index
    %c0_7 = arith.constant 0 : index
    %8 = vector.load %arg4[%c0_6, %c0_7] : memref<128x128xf32, #tpu.memory_space<vmem>>, vector<128x128xf32>
    %cst_8 = arith.constant dense<0.000000e+00> : vector<8x128xf32>
    %9 = tpu.matmul %7, %8, %cst_8 {dimension_numbers = #tpu.dot_dimension_numbers<[1], [0], [0], [1], [0, 0, 1, 1], [], []>} : vector<8x128xf32>, vector<128x128xf32>, vector<8x128xf32> -> vector<8x128xf32>
    %c0_9 = arith.constant 0 : index
    %c0_10 = arith.constant 0 : index
    %10 = vector.load %arg5[%c0_9, %c0_10] : memref<1x128xf32, #tpu.memory_space<vmem>>, vector<1x128xf32>
    %11 = vector.broadcast %10 : vector<1x128xf32> to vector<8x128xf32>
    %12 = arith.addf %9, %11 : vector<8x128xf32>
    %cst_11 = arith.constant 0.000000e+00 : f32
    %13 = vector.broadcast %cst_11 : f32 to vector<8x128xf32>
    %14 = arith.maximumf %12, %13 : vector<8x128xf32>
    %c0_12 = arith.constant 0 : index
    %c0_13 = arith.constant 0 : index
    %15 = vector.load %arg6[%c0_12, %c0_13] : memref<128x128xf32, #tpu.memory_space<vmem>>, vector<128x128xf32>
    %cst_14 = arith.constant dense<0.000000e+00> : vector<8x128xf32>
    %16 = tpu.matmul %14, %15, %cst_14 {dimension_numbers = #tpu.dot_dimension_numbers<[1], [0], [0], [1], [0, 0, 1, 1], [], []>} : vector<8x128xf32>, vector<128x128xf32>, vector<8x128xf32> -> vector<8x128xf32>
    %c0_15 = arith.constant 0 : index
    %c0_16 = arith.constant 0 : index
    %17 = vector.load %arg7[%c0_15, %c0_16] : memref<1x128xf32, #tpu.memory_space<vmem>>, vector<1x128xf32>
    %18 = vector.broadcast %17 : vector<1x128xf32> to vector<8x128xf32>
    %19 = arith.addf %16, %18 : vector<8x128xf32>
    %cst_17 = arith.constant 2.000000e+00 : f32
    %20 = vector.broadcast %cst_17 : f32 to vector<8x128xf32>
    %21 = arith.cmpf olt, %19, %20 : vector<8x128xf32>
    %cst_18 = arith.constant 1.000000e+00 : f32
    %22 = vector.broadcast %cst_18 : f32 to vector<8x128xf32>
    %23 = arith.select %21, %19, %22 : vector<8x128xi1>, vector<8x128xf32>
    %cst_19 = arith.constant -5.000000e-01 : f32
    %24 = vector.broadcast %cst_19 : f32 to vector<8x128xf32>
    %25 = arith.cmpf ogt, %23, %24 : vector<8x128xf32>
    %cst_20 = arith.constant 0.000000e+00 : f32
    %26 = vector.broadcast %cst_20 : f32 to vector<8x128xf32>
    %27 = arith.select %25, %23, %26 : vector<8x128xi1>, vector<8x128xf32>
    %28 = tpu.iota {dimensions = array<i32: 1>} : vector<8x128xi32>
    %c16_i32 = arith.constant 16 : i32
    %29 = vector.broadcast %c16_i32 : i32 to vector<8x128xi32>
    %30 = arith.cmpi eq, %28, %29 : vector<8x128xi32>
    %31 = arith.select %30, %27, %19 : vector<8x128xi1>, vector<8x128xf32>
    %c0_21 = arith.constant 0 : index
    %c0_22 = arith.constant 0 : index
    %32 = vector.load %arg8[%c0_21, %c0_22] : memref<8x128xf32, #tpu.memory_space<vmem>>, vector<8x128xf32>
    tpu.vector_store %arg8[%c0_21, %c0_22], %31 {strides = array<i32>} : memref<8x128xf32, #tpu.memory_space<vmem>>, vector<8x128xf32>,
    return
  }
  func.func @transform_0(%arg0: i32) -> (i32, i32) {
    %c0_i32 = arith.constant 0 : i32
    %c0_i32_0 = arith.constant 0 : i32
    return %arg0, %c0_i32 : i32, i32
  }
  func.func @transform_1(%arg0: i32) -> (i32, i32) {
    %c0_i32 = arith.constant 0 : i32
    %c0_i32_0 = arith.constant 0 : i32
    %c0_i32_1 = arith.constant 0 : i32
    return %c0_i32, %c0_i32_0 : i32, i32
  }
  func.func @transform_2(%arg0: i32) -> (i32, i32) {
    %c0_i32 = arith.constant 0 : i32
    %c0_i32_0 = arith.constant 0 : i32
    %c0_i32_1 = arith.constant 0 : i32
    return %c0_i32, %c0_i32_0 : i32, i32
  }
  func.func @transform_3(%arg0: i32) -> (i32, i32) {
    %c0_i32 = arith.constant 0 : i32
    %c0_i32_0 = arith.constant 0 : i32
    %c0_i32_1 = arith.constant 0 : i32
    return %c0_i32, %c0_i32_0 : i32, i32
  }
  func.func @transform_4(%arg0: i32) -> (i32, i32) {
    %c0_i32 = arith.constant 0 : i32
    %c0_i32_0 = arith.constant 0 : i32
    %c0_i32_1 = arith.constant 0 : i32
    return %c0_i32, %c0_i32_0 : i32, i32
  }
  func.func @transform_5(%arg0: i32) -> (i32, i32) {
    %c0_i32 = arith.constant 0 : i32
    %c0_i32_0 = arith.constant 0 : i32
    %c0_i32_1 = arith.constant 0 : i32
    return %c0_i32, %c0_i32_0 : i32, i32
  }
  func.func @transform_6(%arg0: i32) -> (i32, i32) {
    %c0_i32 = arith.constant 0 : i32
    %c0_i32_0 = arith.constant 0 : i32
    %c0_i32_1 = arith.constant 0 : i32
    return %c0_i32, %c0_i32_0 : i32, i32
  }
  func.func @transform_7(%arg0: i32) -> (i32, i32) {
    %c0_i32 = arith.constant 0 : i32
    %c0_i32_0 = arith.constant 0 : i32
    return %arg0, %c0_i32 : i32, i32
  }
}

</mosaic_0001>

<bundles_post_ra>
// kernel: tpu_custom_call.1
= control target key start
LH: loop header
LB: loop body
LE: loop exit
PB: predicated region body
PF: predicated region fallthrough
CT: control target
= control target key end

     0   :  { %12 = vsyncpa [#allocation3], 0  ;;  %s445_s0 = inlined_call_operand.hbm [shape: f32[8,64], index: 0, kind: input, shape index: {}]   ;;  %s446_s1 = inlined_call_operand.hbm [shape: f32[64,128], index: 1, kind: input, shape index: {}]   ;;  %s447_s2 = inlined_call_operand.vmem [shape: f32[1,128], index: 2, kind: input, shape index: {}]   ;;  %s448_s3 = inlined_call_operand.hbm [shape: f32[128,128], index: 3, kind: input, shape index: {}]   ;;  %s449_s4 = inlined_call_operand.vmem [shape: f32[1,128], index: 4, kind: input, shape index: {}]   ;;  %s450_s5 = inlined_call_operand.hbm [shape: f32[128,128], index: 5, kind: input, shape index: {}]   ;;  %s451_s6 = inlined_call_operand.vmem [shape: f32[1,128], index: 6, kind: input, shape index: {}]   ;;  %s452_s7 = inlined_call_operand.hbm [shape: f32[8,128], index: 7, kind: output, shape index: {}]  }
   0x1   :  { %13 = vsyncpa [#allocation6], 0 }
   0x2   :  { %14 = vsyncpa [#allocation9], 0  ;;  %s31_s26 = sshll.u32 %s446_s1, 4  ;;  %s32_s26 = int_to_ptr.hbm [resolvable:$true] %s31_s26 }
   0x3   :  { %15 = vsyncpa [#allocation4], 0  ;;  %s374_s27 = smov [#allocation5]   ;;  %s21_s8 = sshll.u32 %s445_s0, 4  ;;  %s22_s8 = int_to_ptr.hbm [resolvable:$true] %s21_s8 }
   0x4   :  { %s33_s28 = sshll.u32 %s374_s27, 4  ;;  %s375_s9 = smov 128   ;;  %s34_s28 = int_to_ptr.vmem [resolvable:$true] %s33_s28 }
   0x5   :  { %s376_s10 = smov 8   ;;  %s377_s11 = smov [#allocation2]  }
   0x6   :  { %39 = dma.hbm_to_vmem [thread:$0]  %s32_s26, 1024, %s34_s28, [#allocation6], %s375_s9, %s375_s9, %s376_s10  }
   0x7   :  { %s23_s12 = sshll.u32 %s377_s11, 4  ;;  %s46_s15 = sshll.u32 %s448_s3, 4  ;;  %s24_s12 = int_to_ptr.vmem [resolvable:$true] %s23_s12  ;;  %s47_s15 = int_to_ptr.hbm [resolvable:$true] %s46_s15 }
   0x8   :  { %26 = dma.hbm_to_vmem [thread:$0]  %s22_s8, 128, %s24_s12, [#allocation3]  }
   0x9   :  { %s61_s17 = sshll.u32 %s450_s5, 4  ;;  %s378_s18 = smov [#allocation7]   ;;  %s62_s17 = int_to_ptr.hbm [resolvable:$true] %s61_s17 }
   0xa   :  { %s48_s19 = sshll.u32 %s378_s18, 4  ;;  %s379_s0 = smov [#allocation8]   ;;  %s49_s19 = int_to_ptr.vmem [resolvable:$true] %s48_s19 }
   0xb   :  { %54 = dma.hbm_to_vmem [thread:$0]  %s47_s15, 2048, %s49_s19, [#allocation6], %s375_s9, %s375_s9, %s376_s10  }
   0xc   :  { %s63_s20 = sshll.u32 %s379_s0, 4  ;;  %s64_s20 = int_to_ptr.vmem [resolvable:$true] %s63_s20 }
   0xd   :  { %69 = dma.hbm_to_vmem [thread:$0]  %s62_s17, 2048, %s64_s20, [#allocation9], %s375_s9, %s375_s9, %s376_s10  }
   0xe   :  { %366 = dma.done.wait [#allocation3], 128  }
   0xf   :  { %367 = vsyncadd [#allocation3], 4294967168 }
  0x10   :  { %368 = dma.done.wait [#allocation6], 3072  }
  0x11   :  { %369 = vsyncadd [#allocation6], 4294964224 }
  0x12   :  { %370 = dma.done.wait [#allocation9], 2048  }
  0x13   :  { %371 = vsyncadd [#allocation9], 4294965248  ;;  %v96_v0 = vld [vmem:[#allocation5 + $0x38] sm:$0xff]  ;;  %v95_v1 = vld [vmem:[#allocation5 + $0x30] sm:$0xff]  ;;  %vm101_vm0 = vcmask 523264   ;;  %v211_v49 = vlaneseq  ;;  %s380_s24 = smov [#allocation10]  }
  0x14   :  { %113 = vmatpush.msra.mxu0 %v96_v0  ;;  %v94_v2 = vld [vmem:[#allocation5 + $0x28] sm:$0xff]  ;;  %v141_v3 = vld [vmem:[#allocation7 + $0x78] sm:$0xff]  ;;  %v140_v4 = vld [vmem:[#allocation7 + $0x70] sm:$0xff]  ;;  %s221_s25 = sshll.u32 %s380_s24, 4  ;;  %s223_s28 = sshll.u32 %s452_s7, 4  ;;  %s222_s25 = int_to_ptr.vmem [resolvable:$true] %s221_s25  ;;  %s224_s28 = int_to_ptr.hbm [resolvable:$true] %s223_s28 }
  0x15   :  { %v93_v5 = vld [vmem:[#allocation5 + $0x20] sm:$0xff]  ;;  %146 = vmatpush.msra.mxu1 %v141_v3  ;;  %v139_v6 = vld [vmem:[#allocation7 + $0x68] sm:$0xff]  ;;  %v92_v7 = vld [vmem:[#allocation5 + $0x18] sm:$0xff]  ;;  %v212_v52 = vand.u32 127, %v211_v49 }
  0x16   :  { %114 = vmatpush.msra.mxu0 %v95_v1  ;;  %v138_v8 = vld [vmem:[#allocation7 + $0x60] sm:$0xff]  ;;  %v91_v9 = vld [vmem:[#allocation5 + $0x10] sm:$0xff]  ;;  %v137_v10 = vld [vmem:[#allocation7 + $0x58] sm:$0xff] }
  0x17   :  { %147 = vmatpush.msra.mxu1 %v140_v4  ;;  %v90_v11 = vld [vmem:[#allocation5 + $0x8] sm:$0xff]  ;;  %v136_v12 = vld [vmem:[#allocation7 + $0x50] sm:$0xff]  ;;  %v89_v13 = vld [vmem:[#allocation5] sm:$0xff]  ;;  %vm213_vm2 = vcmp.eq.s32.totalorder %v212_v52, 16 }
  0x18   :  { %115 = vmatpush.msra.mxu0 %v94_v2  ;;  %v88_v14 = vld [vmem:[#allocation2] sm:$0xff]  ;;  %v135_v15 = vld [vmem:[#allocation7 + $0x48] sm:$0xff]  ;;  %v134_v16 = vld [vmem:[#allocation7 + $0x40] sm:$0xff] }
  0x19   :  { %148 = vmatpush.msra.mxu1 %v139_v6  ;;  %v133_v17 = vld [vmem:[#allocation7 + $0x38] sm:$0xff]  ;;  %v132_v18 = vld [vmem:[#allocation7 + $0x30] sm:$0xff]  ;;  %v131_v19 = vld [vmem:[#allocation7 + $0x28] sm:$0xff] }
  0x1a   :  { %116 = vmatpush.msra.mxu0 %v93_v5  ;;  %v130_v20 = vld [vmem:[#allocation7 + $0x20] sm:$0xff]  ;;  %v129_v21 = vld [vmem:[#allocation7 + $0x18] sm:$0xff]  ;;  %v128_v22 = vld [vmem:[#allocation7 + $0x10] sm:$0xff] }
  0x1b   :  { %149 = vmatpush.msra.mxu1 %v138_v8  ;;  %v127_v23 = vld [vmem:[#allocation7 + $0x8] sm:$0xff]  ;;  %v126_v24 = vld [vmem:[#allocation7] sm:$0xff]  ;;  %v182_v25 = vld [vmem:[#allocation8 + $0x78] sm:$0xff] }
  0x1c   :  { %117 = vmatpush.msra.mxu0 %v92_v7  ;;  %v181_v26 = vld [vmem:[#allocation8 + $0x70] sm:$0xff]  ;;  %187 = vmatpush.msra.mxu2 %v182_v25  ;;  %v180_v27 = vld [vmem:[#allocation8 + $0x68] sm:$0xff]  ;;  %v179_v28 = vld [vmem:[#allocation8 + $0x60] sm:$0xff] }
  0x1d   :  { %150 = vmatpush.msra.mxu1 %v137_v10  ;;  %v178_v29 = vld [vmem:[#allocation8 + $0x58] sm:$0xff]  ;;  %v177_v30 = vld [vmem:[#allocation8 + $0x50] sm:$0xff]  ;;  %v176_v31 = vld [vmem:[#allocation8 + $0x48] sm:$0xff] }
  0x1e   :  { %118 = vmatpush.msra.mxu0 %v91_v9  ;;  %188 = vmatpush.msra.mxu2 %v181_v26  ;;  %v175_v32 = vld [vmem:[#allocation8 + $0x40] sm:$0xff]  ;;  %v174_v33 = vld [vmem:[#allocation8 + $0x38] sm:$0xff]  ;;  %v173_v34 = vld [vmem:[#allocation8 + $0x30] sm:$0xff] }
  0x1f   :  { %151 = vmatpush.msra.mxu1 %v136_v12  ;;  %v172_v35 = vld [vmem:[#allocation8 + $0x28] sm:$0xff]  ;;  %v171_v36 = vld [vmem:[#allocation8 + $0x20] sm:$0xff]  ;;  %v170_v37 = vld [vmem:[#allocation8 + $0x18] sm:$0xff] }
  0x20   :  { %119 = vmatpush.msra.mxu0 %v90_v11  ;;  %189 = vmatpush.msra.mxu2 %v180_v27  ;;  %v243_v38 = vld [vmem:[%s447_s2] ss:$0 sm:$0xff]  ;;  %v169_v42 = vld [vmem:[#allocation8 + $0x10] sm:$0xff]  ;;  %v168_v43 = vld [vmem:[#allocation8 + $0x8] sm:$0xff] }
  0x21   :  { %152 = vmatpush.msra.mxu1 %v135_v15  ;;  %v167_v44 = vld [vmem:[#allocation8] sm:$0xff]  ;;  %v244_v45 = vld [vmem:[%s449_s4] ss:$0 sm:$0xff] }
  0x22   :  { %120 = vmatpush.msra.mxu0 %v89_v13  ;;  %190 = vmatpush.msra.mxu2 %v179_v28  ;;  %v245_v50 = vld [vmem:[%s451_s6] ss:$0 sm:$0xff] }
  0x23   :  { %235 = vmatmul.msk.f32.vlgmr.msra.gmra.mxu0 %vm101_vm0, %v88_v14  ;;  %153 = vmatpush.msra.mxu1 %v134_v16 }
  0x24   :  { %191 = vmatpush.msra.mxu2 %v178_v29 }
  0x25   :  { %154 = vmatpush.msra.mxu1 %v133_v17 }
  0x26   :  { %192 = vmatpush.msra.mxu2 %v177_v30 }
  0x27   :  { %155 = vmatpush.msra.mxu1 %v132_v18 }
  0x28   :  { %193 = vmatpush.msra.mxu2 %v176_v31 }
  0x29   :  { %156 = vmatpush.msra.mxu1 %v131_v19 }
  0x2a   :  { %194 = vmatpush.msra.mxu2 %v175_v32 }
  0x2b   :  { %157 = vmatpush.msra.mxu1 %v130_v20 }
  0x2c   :  { %195 = vmatpush.msra.mxu2 %v174_v33 }
  0x2d   :  { %158 = vmatpush.msra.mxu1 %v129_v21 }
  0x2e   :  { %196 = vmatpush.msra.mxu2 %v173_v34 }
  0x2f   :  { %159 = vmatpush.msra.mxu1 %v128_v22 }
  0x30   :  { %197 = vmatpush.msra.mxu2 %v172_v35 }
  0x31   :  { %160 = vmatpush.msra.mxu1 %v127_v23 }
  0x32   :  { %198 = vmatpush.msra.mxu2 %v171_v36 }
  0x33   :  { %161 = vmatpush.msra.mxu1 %v126_v24 }
  0x34   :  { %199 = vmatpush.msra.mxu2 %v170_v37 }
  0x36   :  { %200 = vmatpush.msra.mxu2 %v169_v42 }
  0x38   :  { %201 = vmatpush.msra.mxu2 %v168_v43 }
  0x3a   :  { %202 = vmatpush.msra.mxu2 %v167_v44 }
  0xa0   :  { %v122_v39 = vpop.f32.mrf.mxu0 }
  0xa1   :  { %v123_v40 = vadd.f32 %v243_v38, %v122_v39 }
  0xa3   :  { %v125_v41 = vmax.f32 %v123_v40, 0.0 }
  0xa5   :  { %162 = vmatmul.f32.vlgmr.msra.gmra.mxu1 %v125_v41 }
 0x122   :  { %v163_v46 = vpop.f32.mrf.mxu1 }
 0x123   :  { %v164_v47 = vadd.f32 %v244_v45, %v163_v46 }
 0x125   :  { %v166_v48 = vmax.f32 %v164_v47, 0.0 }
 0x127   :  { %203 = vmatmul.f32.vlgmr.msra.gmra.mxu2 %v166_v48 }
 0x1aa   :  { %v204_v51 = vpop.f32.mrf.mxu2 }
 0x1ab   :  { %v205_v53 = vadd.f32 %v245_v50, %v204_v51 }
 0x1ad   :  { %vm207_vm1 = vcmp.lt.f32.partialorder %v205_v53, 2.0 }
 0x1ae   :  { %v208_v54 = vsel %vm207_vm1, %v205_v53, 1.0 }
 0x1af   :  { %vm209_vm3 = vcmp.gt.f32.partialorder %v208_v54, -0.5 }
 0x1b0   :  { %v210_v55 = vsel %vm209_vm3, %v208_v54, 0.0 }
 0x1b1   :  { %v214_v56 = vsel %vm213_vm2, %v210_v55, %v205_v53 }
 0x1b2   :  { %215 = vst [vmem:[#allocation10] sm:$0xff] %v214_v56 }
 0x1b3   :  { %226 = dma.vmem_to_hbm [thread:$0]  %s222_s25, 128, %s224_s28, [#allocation4]  }
 0x1b4   :  { %372 = dma.done.wait [#allocation4], 128  }
 0x1b5   :  { %373 = vsyncadd [#allocation4], 4294967168 }
 0x1b6   :  { %231 = vsyncpa [#allocation3], 1 }
 0x1b7   :  { %232 = vsyncpa [#allocation6], 1 }
 0x1b8   :  { %233 = vsyncpa [#allocation9], 1 }
 0x1b9   :  { %234 = vsyncpa [#allocation4], 1 }

</bundles_post_ra>
